<compile_context>
chip_gen: v5e
topology: v5e:2x2
jax: 0.10.0
libtpu: 0.0.40
codegen_flags: <defaults>
</compile_context>

<pallas_src>
import jax
import jax.numpy as jnp
from jax.experimental import pallas as pl
from jax.experimental.pallas import tpu as pltpu

_LANE = 128


def _add_pe_kernel(pe_ref, x_ref, o_ref):
    # pe_ref broadcasts against the x tile; a single VPU add per element.
    o_ref[...] = x_ref[...] + pe_ref[...]


def _pe_table(L, denominator, d_model, dtype):
    # Computed once (tiny: L elements), exactly as the PyTorch reference does.
    scale = 1.0 / (float(denominator) ** (2.0 * float(L) / float(d_model)))
    pos = jnp.arange(L, dtype=jnp.float32)
    inp = pos * scale
    pe = jnp.where((jnp.arange(L) % 2) == 1, jnp.cos(inp), jnp.sin(inp))
    return pe.astype(dtype)


def _pick_rows(total_rows, row_bytes, target_bytes=2 * 1024 * 1024):
    # Tile rows: multiple of 8 (sublanes) and ~2 MiB per buffer so the
    # double-buffered input+output pipeline stays well inside scoped VMEM on
    # v5e/v6e (128 MiB) and v7x (64 MiB physical / 32 MiB scoped).
    if total_rows % 8 != 0:
        return int(total_rows)                 # full-extent block is always legal
    rows = (target_bytes // max(row_bytes, 1)) // 8 * 8
    return int(max(8, min(total_rows, rows)))


def positional_encoding(x, *, denominator=10000, d_model=512):
    """x: (B, S, D). Returns x + pe where pe is built from L = x.shape[2]."""
    B, S, D = x.shape
    pe = _pe_table(D, denominator, d_model, x.dtype)
    itemsize = jnp.dtype(x.dtype).itemsize
    total = B * S * D

    if D % _LANE != 0 and _LANE % D == 0 and total % _LANE == 0:
        # Small-D path: flatten to lane-dense (rows, 128) tiles. Since D divides
        # 128, pe repeats identically within every 128-lane row, so one tiled
        # (1, 128) pe row covers every column of every row.
        rows = total // _LANE
        pe_row = jnp.tile(pe, _LANE // D).reshape(1, _LANE)
        x2 = x.reshape(rows, _LANE)
        t_rows = _pick_rows(rows, _LANE * itemsize)
        out2 = pl.pallas_call(
            _add_pe_kernel,
            out_shape=jax.ShapeDtypeStruct((rows, _LANE), x.dtype),
            grid=(pl.cdiv(rows, t_rows),),
            in_specs=[
                pl.BlockSpec((1, _LANE), lambda r: (0, 0)),
                pl.BlockSpec((t_rows, _LANE), lambda r: (r, 0)),
            ],
            out_specs=pl.BlockSpec((t_rows, _LANE), lambda r: (r, 0)),
            input_output_aliases={1: 0},          # out = x + pe (in-place friendly)
            compiler_params=pltpu.CompilerParams(
                dimension_semantics=("parallel",)),
        )(pe_row, x2)
        return out2.reshape(B, S, D)

    # General path: keep (B, S, D); tile S, broadcast the (1, 1, D) pe slab.
    pe3 = pe.reshape(1, 1, D)
    t_s = _pick_rows(S, D * itemsize)
    return pl.pallas_call(
        _add_pe_kernel,
        out_shape=jax.ShapeDtypeStruct((B, S, D), x.dtype),
        grid=(B, pl.cdiv(S, t_s)),
        in_specs=[
            pl.BlockSpec((1, 1, D), lambda b, s: (0, 0, 0)),
            pl.BlockSpec((1, t_s, D), lambda b, s: (b, s, 0)),
        ],
        out_specs=pl.BlockSpec((1, t_s, D), lambda b, s: (b, s, 0)),
        input_output_aliases={1: 0},
        compiler_params=pltpu.CompilerParams(
            dimension_semantics=("parallel", "parallel")),
    )(pe3, x)


def _reference(x, denominator=10000, d_model=512):
    # Pure-JAX reference mirroring the PyTorch forward exactly.
    L = x.shape[2]
    pos = jnp.arange(L, dtype=jnp.float32)
    inp = pos / (float(denominator) ** (2.0 * L / float(d_model)))
    pe = jnp.where((jnp.arange(L) % 2) == 1, jnp.cos(inp), jnp.sin(inp))
    return pe + x


if __name__ == "__main__":
    key = jax.random.PRNGKey(0)
    k1, k2 = jax.random.split(key)

    # Shape implied by the module: (batch, seq, hidden) = (2, 8, 32).
    # D=32 < 128 exercises the lane-dense flattened path.
    x_small = jax.random.normal(k1, (2, 8, 32), dtype=jnp.float32)
    out_small = jax.block_until_ready(
        positional_encoding(x_small, denominator=10000, d_model=512))
    ref_small = _reference(x_small, denominator=10000, d_model=512)
    assert out_small.shape == ref_small.shape and out_small.dtype == ref_small.dtype
    assert jnp.allclose(out_small, ref_small, atol=1e-5, rtol=1e-5)

    # A lane-aligned shape exercises the tiled (B, S, D) path.
    x_wide = jax.random.normal(k2, (2, 16, 128), dtype=jnp.float32)
    out_wide = jax.block_until_ready(
        positional_encoding(x_wide, denominator=10000, d_model=512))
    ref_wide = _reference(x_wide, denominator=10000, d_model=512)
    assert jnp.allclose(out_wide, ref_wide, atol=1e-5, rtol=1e-5)

    print("KERNEL_OK")
</pallas_src>

<mosaic_0001>
module attributes {stable_mosaic.version = 11 : i64} {
  func.func @_add_pe_kernel(%arg0: i32, %arg1: memref<1x128xf32, #tpu.memory_space<vmem>>, %arg2: memref<4x128xf32, #tpu.memory_space<vmem>>, %arg3: memref<4x128xf32, #tpu.memory_space<vmem>>) attributes {dimension_semantics = [#tpu.dimension_semantics<parallel>], iteration_bounds = array<i64: 1>, scalar_prefetch = 0 : i64, scratch_operands = 0 : i64, tpu.core_type = #tpu.core_type<tc>, window_params = [{pipeline_mode = #tpu.pipeline_mode<synchronous>, transform_indices = @transform_0, window_bounds = array<i64: 1, 128>}, {transform_indices = @transform_1, window_bounds = array<i64: 4, 128>}, {transform_indices = @transform_2, window_bounds = array<i64: 4, 128>}]} {
    %c0 = arith.constant 0 : index
    %c0_0 = arith.constant 0 : index
    %0 = vector.load %arg2[%c0, %c0_0] : memref<4x128xf32, #tpu.memory_space<vmem>>, vector<4x128xf32>
    %c0_1 = arith.constant 0 : index
    %c0_2 = arith.constant 0 : index
    %1 = vector.load %arg1[%c0_1, %c0_2] : memref<1x128xf32, #tpu.memory_space<vmem>>, vector<1x128xf32>
    %2 = vector.broadcast %1 : vector<1x128xf32> to vector<4x128xf32>
    %3 = arith.addf %0, %2 : vector<4x128xf32>
    %c0_3 = arith.constant 0 : index
    %c0_4 = arith.constant 0 : index
    %4 = vector.load %arg3[%c0_3, %c0_4] : memref<4x128xf32, #tpu.memory_space<vmem>>, vector<4x128xf32>
    tpu.vector_store %arg3[%c0_3, %c0_4], %3 {strides = array<i32>} : memref<4x128xf32, #tpu.memory_space<vmem>>, vector<4x128xf32>,
    return
  }
  func.func @transform_0(%arg0: i32) -> (i32, i32) {
    %c0_i32 = arith.constant 0 : i32
    %c0_i32_0 = arith.constant 0 : i32
    %c0_i32_1 = arith.constant 0 : i32
    return %c0_i32, %c0_i32_0 : i32, i32
  }
  func.func @transform_1(%arg0: i32) -> (i32, i32) {
    %c0_i32 = arith.constant 0 : i32
    %c0_i32_0 = arith.constant 0 : i32
    return %arg0, %c0_i32 : i32, i32
  }
  func.func @transform_2(%arg0: i32) -> (i32, i32) {
    %c0_i32 = arith.constant 0 : i32
    %c0_i32_0 = arith.constant 0 : i32
    return %arg0, %c0_i32 : i32, i32
  }
}

</mosaic_0001>

<bundles_post_ra>
// kernel: tpu_custom_call.1
= control target key start
LH: loop header
LB: loop body
LE: loop exit
PB: predicated region body
PF: predicated region fallthrough
CT: control target
= control target key end

     0   :  { %7 = vsyncpa [#allocation3], 0  ;;  %s131_s0 = inlined_call_operand.vmem [shape: f32[1,128], index: 0, kind: input, shape index: {}]   ;;  %s132_s1 = inlined_call_operand.hbm [shape: f32[4,128], index: 1, kind: input, shape index: {}, may-alias: {1,2}]   ;;  %s133_s2 = inlined_call_operand.hbm [shape: f32[4,128], index: 2, kind: output, shape index: {}, may-alias: {1,2}]  }
   0x1   :  { %8 = vsyncpa [#allocation4], 0  ;;  %s16_s11 = sshll.u32 %s132_s1, 4  ;;  %s105_s12 = smov [#allocation2]   ;;  %s17_s11 = int_to_ptr.hbm [resolvable:$true] %s16_s11 }
   0x2   :  { %s18_s13 = sshll.u32 %s105_s12, 4  ;;  %s19_s13 = int_to_ptr.vmem [resolvable:$true] %s18_s13 }
   0x3   :  { %21 = dma.hbm_to_vmem [thread:$0]  %s17_s11, 64, %s19_s13, [#allocation3]  }
   0x4   :  { %101 = dma.done.wait [#allocation3], 64  }
   0x5   :  { %102 = vsyncadd [#allocation3], 4294967232  ;;  %s106_s14 = smov [#allocation5]   ;;  %s40_s18 = sshll.u32 %s133_s2, 4  ;;  %v26_v0 = vld [vmem:[#allocation2] sm:$0xf]  ;;  %s41_s18 = int_to_ptr.hbm [resolvable:$true] %s40_s18 }
   0x6   :  { %s38_s15 = sshll.u32 %s106_s14, 4  ;;  %v52_v1 = vld [vmem:[%s131_s0] ss:$0 sm:$0xff]  ;;  %s39_s15 = int_to_ptr.vmem [resolvable:$true] %s38_s15 }
   0x7   :  { %v31_v2 = vadd.f32 %v52_v1, %v26_v0 }
   0x9   :  { %32 = vst [vmem:[#allocation5] sm:$0xf] %v31_v2 }
   0xa   :  { %43 = dma.vmem_to_hbm [thread:$0]  %s39_s15, 64, %s41_s18, [#allocation4]  }
   0xb   :  { %103 = dma.done.wait [#allocation4], 64  }
   0xc   :  { %104 = vsyncadd [#allocation4], 4294967232 }
   0xd   :  { %48 = vsyncpa [#allocation3], 1 }
   0xe   :  { %49 = vsyncpa [#allocation4], 1 }

</bundles_post_ra>
